<compile_context>
chip_gen: v7x
topology: tpu7x:2x2x1
jax: 0.10.0
libtpu: 0.0.40
codegen_flags: <defaults>
</compile_context>

<pallas_src>
import functools
import math

import jax
import jax.numpy as jnp
from jax.experimental import pallas as pl
from jax.experimental.pallas import tpu as pltpu

D_MODEL = 32
N_HEAD = 4
HEAD_DIM = D_MODEL // N_HEAD
LN_EPS = 1e-5


def _residual_attention_kernel(x_ref, res_ref, wi_t_ref, bi_ref, wo_t_ref, bo_ref,
                               g_ref, b_ref, out_ref, *, bt, seq, n_head):
    rows, dm = x_ref.shape
    hd = dm // n_head

    x = x_ref[...].astype(jnp.bfloat16)        # (rows, D)  bf16 MXU operand
    res = res_ref[...].astype(jnp.float32)     # (rows, D)
    wi_t = wi_t_ref[...]                       # (D, 3D) bf16, Q cols pre-scaled
    bi = bi_ref[...]                           # (1, 3D) f32, Q slice pre-scaled
    wo_t = wo_t_ref[...]                       # (D, D)  bf16 (pre-transposed)
    bo = bo_ref[...]                           # (1, D)  f32
    gamma = g_ref[...]                         # (1, D)  f32
    beta = b_ref[...]                          # (1, D)  f32

    # Fused QKV projection: one MXU push over all batch*seq rows, f32 accumulation.
    qkv = jnp.dot(x, wi_t, preferred_element_type=jnp.float32) + bi      # (rows, 3D)

    # Gather per-head slices onto a single merged (n_head*bt) leading batch dim so
    # the whole attention is two head-batched rank-3 contractions + one softmax.
    def heads(base):
        parts = [qkv[:, base + h * hd: base + (h + 1) * hd].reshape(bt, seq, hd)
                 for h in range(n_head)]
        return jnp.concatenate(parts, axis=0).astype(jnp.bfloat16)       # (H*bt, L, hd)

    qh = heads(0)          # already carries the 1/sqrt(head_dim) scale
    kh = heads(dm)
    vh = heads(2 * dm)

    s = jnp.einsum('gld,gmd->glm', qh, kh,
                   preferred_element_type=jnp.float32)                   # (H*bt, L, L)
    m = jnp.max(s, axis=-1, keepdims=True)
    e = jnp.exp(s - m)
    p = e * pl.reciprocal(jnp.sum(e, axis=-1, keepdims=True), approx=True)
    oh = jnp.einsum('glm,gmd->gld', p.astype(jnp.bfloat16), vh,
                    preferred_element_type=jnp.float32)                  # (H*bt, L, hd)

    # Re-merge heads onto the feature dim: (bt, L, D) -> (rows, D).
    attn = jnp.concatenate([oh[h * bt:(h + 1) * bt] for h in range(n_head)],
                           axis=-1).reshape(rows, dm)

    # Output projection (single MXU push), residual add (dropout p=0 -> identity),
    # then LayerNorm (biased variance, eps=1e-5) in f32.
    attn2 = jnp.dot(attn.astype(jnp.bfloat16), wo_t,
                    preferred_element_type=jnp.float32) + bo             # (rows, D)
    tokens = res + attn2
    mu = jnp.mean(tokens, axis=-1, keepdims=True)
    var = jnp.mean((tokens - mu) ** 2, axis=-1, keepdims=True)
    out = (tokens - mu) * jax.lax.rsqrt(var + LN_EPS) * gamma + beta
    out_ref[...] = out.astype(out_ref.dtype)


def _vmem_capacity_bytes():
    try:
        return int(pltpu.get_tpu_info().vmem_capacity_bytes)
    except Exception:
        return 64 * 1024 * 1024      # conservative fallback (v7x per-TC VMEM)


def _kernel_footprint_bytes(bt, L, D, n_head):
    f32 = 4
    rows = bt * L
    act_io = 3 * rows * D * f32                 # q, res, out blocks
    dbuf = 2 * act_io                           # double-buffered by the pipeline
    qkv = 3 * rows * D * f32                    # fused projection output
    scores = 3 * bt * n_head * L * L * f32      # s, e, p live ranges
    attn = 2 * rows * D * f32                   # attn + tokens
    return dbuf + qkv + scores + attn


def _pick_batch_tile(B, L, D, n_head, vmem_budget_bytes):
    divisors = [d for d in range(1, B + 1) if B % d == 0]
    fitting = [d for d in divisors
               if _kernel_footprint_bytes(d, L, D, n_head) <= vmem_budget_bytes]
    if not fitting:
        fitting = [1]
    bt = max(fitting)                            # biggest tile that fits VMEM
    # Keep >= 2 grid steps when possible: both v7x TensorCores get work and the
    # auto-pipeline can overlap DMA with compute (costs one ~0.35us step on v6e).
    if B // bt < 2:
        smaller = [d for d in fitting if B // d >= 2]
        if smaller:
            bt = max(smaller)
    return bt


def residual_attention(query, residual, params, *, batch_tile=None):
    """query/residual: (B, L, D); params in torch nn.MultiheadAttention layout."""
    B, L, D = query.shape
    assert D % N_HEAD == 0
    wi, bi, wo, bo, g, b = params

    # Hoist grid-invariant weight transforms out of the kernel: transpose projection
    # weights (lane-major, so the kernel computes x @ W) and fold 1/sqrt(head_dim)
    # into the Q slice of the in-proj weight + bias.  Weights go to bf16 (MXU operand
    # dtype); biases / LN params stay f32 (added post-accumulation).
    scale = 1.0 / math.sqrt(D // N_HEAD)
    col_scale = jnp.concatenate([jnp.full((D,), scale, jnp.float32),
                                 jnp.ones((2 * D,), jnp.float32)])[None, :]  # (1, 3D)
    wi_t = (wi.astype(jnp.float32).T * col_scale).astype(jnp.bfloat16)       # (D, 3D)
    bi_s = bi.astype(jnp.float32) * col_scale                                # (1, 3D)
    wo_t = wo.astype(jnp.float32).T.astype(jnp.bfloat16)                     # (D, D)
    bo_f = bo.astype(jnp.float32)
    g_f = g.astype(jnp.float32)
    b_f = b.astype(jnp.float32)

    vmem_cap = _vmem_capacity_bytes()
    bt = batch_tile if batch_tile is not None else _pick_batch_tile(
        B, L, D, N_HEAD, vmem_cap // 2)
    assert B % bt == 0, "batch must be divisible by batch_tile"
    grid = (B // bt,)
    rows_blk = bt * L
    assert (rows_blk % 8 == 0) or (bt == B), \
        "per-step row block must be sublane (8) aligned or cover the full batch"
    foot = _kernel_footprint_bytes(bt, L, D, N_HEAD)
    vmem_limit = int(min(vmem_cap * 3 // 4, max(32 << 20, 4 * foot)))

    # Flat (B*L, D) row blocks: reshapes hoisted out of the kernel.
    q2 = query.reshape(B * L, D)
    r2 = residual.reshape(B * L, D)

    act_spec = pl.BlockSpec((rows_blk, D), lambda i: (i, 0))

    def full_spec(shape):
        return pl.BlockSpec(shape, lambda i, _s=shape: (0,) * len(_s))

    kernel = functools.partial(_residual_attention_kernel,
                               bt=bt, seq=L, n_head=N_HEAD)

    out2 = pl.pallas_call(
        kernel,
        out_shape=jax.ShapeDtypeStruct((B * L, D), query.dtype),
        grid=grid,
        in_specs=[act_spec, act_spec,
                  full_spec(wi_t.shape), full_spec(bi_s.shape),
                  full_spec(wo_t.shape), full_spec(bo_f.shape),
                  full_spec(g_f.shape), full_spec(b_f.shape)],
        out_specs=act_spec,
        compiler_params=pltpu.CompilerParams(
            dimension_semantics=("parallel",),
            vmem_limit_bytes=vmem_limit),
    )(q2, r2, wi_t, bi_s, wo_t, bo_f, g_f, b_f)
    return out2.reshape(B, L, D)


def reference(query, residual, params):
    wi, bi, wo, bo, g, b = params
    B, L, D = query.shape
    hd = D // N_HEAD
    qkv = jnp.einsum("bld,ed->ble", query, wi) + bi[0]            # (B, L, 3D)
    qp, kp, vp = jnp.split(qkv, 3, axis=-1)

    def split_heads(t):
        return t.reshape(B, L, N_HEAD, hd).transpose(0, 2, 1, 3)

    qh, kh, vh = split_heads(qp), split_heads(kp), split_heads(vp)
    s = jnp.einsum("bhqd,bhkd->bhqk", qh, kh) / math.sqrt(hd)
    p = jax.nn.softmax(s, axis=-1)
    o = jnp.einsum("bhqk,bhkd->bhqd", p, vh)
    o = o.transpose(0, 2, 1, 3).reshape(B, L, D)
    attn = jnp.einsum("bld,ed->ble", o, wo) + bo[0]
    tokens = residual + attn
    mu = jnp.mean(tokens, axis=-1, keepdims=True)
    var = jnp.mean((tokens - mu) ** 2, axis=-1, keepdims=True)
    return (tokens - mu) * jax.lax.rsqrt(var + LN_EPS) * g[0] + b[0]


def init_params(key):
    k1, k2, k3, k4 = jax.random.split(key, 4)
    # matches nn.MultiheadAttention parameter shapes (d_model=32, n_head=4)
    wi = jax.random.normal(k1, (3 * D_MODEL, D_MODEL), jnp.float32) * 0.1
    bi = jax.random.normal(k2, (1, 3 * D_MODEL), jnp.float32) * 0.1
    wo = jax.random.normal(k3, (D_MODEL, D_MODEL), jnp.float32) * 0.1
    bo = jax.random.normal(k4, (1, D_MODEL), jnp.float32) * 0.1
    g = jnp.ones((1, D_MODEL), jnp.float32)
    b = jnp.zeros((1, D_MODEL), jnp.float32)
    return wi, bi, wo, bo, g, b


if __name__ == "__main__":
    key = jax.random.PRNGKey(0)
    kq, kr, kp = jax.random.split(key, 3)
    B, L = 2, 8
    query = jax.random.normal(kq, (B, L, D_MODEL), jnp.float32)
    residual = jax.random.normal(kr, (B, L, D_MODEL), jnp.float32)
    params = init_params(kp)

    out = residual_attention(query, residual, params)
    out = jax.block_until_ready(out)

    ref = reference(query, residual, params)
    assert out.shape == (B, L, D_MODEL)
    # Tolerance covers bf16 MXU operands (f32 accumulation) plus the approximate EUP
    # reciprocal in the softmax; real bugs produce O(0.1)+ errors and still fail.
    assert jnp.allclose(out, ref, atol=3e-2, rtol=3e-2), "mismatch vs reference"
    print("KERNEL_OK")
</pallas_src>

<mosaic_0001>
module attributes {stable_mosaic.version = 11 : i64} {
  func.func @_residual_attention_kernel(%arg0: i32, %arg1: memref<8x32xf32, #tpu.memory_space<vmem>>, %arg2: memref<8x32xf32, #tpu.memory_space<vmem>>, %arg3: memref<32x96xbf16, #tpu.memory_space<vmem>>, %arg4: memref<1x96xf32, #tpu.memory_space<vmem>>, %arg5: memref<32x32xbf16, #tpu.memory_space<vmem>>, %arg6: memref<1x32xf32, #tpu.memory_space<vmem>>, %arg7: memref<1x32xf32, #tpu.memory_space<vmem>>, %arg8: memref<1x32xf32, #tpu.memory_space<vmem>>, %arg9: memref<8x32xf32, #tpu.memory_space<vmem>>) attributes {dimension_semantics = [#tpu.dimension_semantics<parallel>], iteration_bounds = array<i64: 2>, scalar_prefetch = 0 : i64, scratch_operands = 0 : i64, tpu.core_type = #tpu.core_type<tc>, window_params = [{transform_indices = @transform_0, window_bounds = array<i64: 8, 32>}, {transform_indices = @transform_1, window_bounds = array<i64: 8, 32>}, {pipeline_mode = #tpu.pipeline_mode<synchronous>, transform_indices = @transform_2, window_bounds = array<i64: 32, 96>}, {pipeline_mode = #tpu.pipeline_mode<synchronous>, transform_indices = @transform_3, window_bounds = array<i64: 1, 96>}, {pipeline_mode = #tpu.pipeline_mode<synchronous>, transform_indices = @transform_4, window_bounds = array<i64: 32, 32>}, {pipeline_mode = #tpu.pipeline_mode<synchronous>, transform_indices = @transform_5, window_bounds = array<i64: 1, 32>}, {pipeline_mode = #tpu.pipeline_mode<synchronous>, transform_indices = @transform_6, window_bounds = array<i64: 1, 32>}, {pipeline_mode = #tpu.pipeline_mode<synchronous>, transform_indices = @transform_7, window_bounds = array<i64: 1, 32>}, {transform_indices = @transform_8, window_bounds = array<i64: 8, 32>}]} {
    %c0 = arith.constant 0 : index
    %c0_0 = arith.constant 0 : index
    %0 = vector.load %arg1[%c0, %c0_0] : memref<8x32xf32, #tpu.memory_space<vmem>>, vector<8x32xf32>
    %1 = arith.truncf %0 : vector<8x32xf32> to vector<8x32xbf16>
    %c0_1 = arith.constant 0 : index
    %c0_2 = arith.constant 0 : index
    %2 = vector.load %arg2[%c0_1, %c0_2] : memref<8x32xf32, #tpu.memory_space<vmem>>, vector<8x32xf32>
    %c0_3 = arith.constant 0 : index
    %c0_4 = arith.constant 0 : index
    %3 = vector.load %arg3[%c0_3, %c0_4] : memref<32x96xbf16, #tpu.memory_space<vmem>>, vector<32x96xbf16>
    %c0_5 = arith.constant 0 : index
    %c0_6 = arith.constant 0 : index
    %4 = vector.load %arg4[%c0_5, %c0_6] : memref<1x96xf32, #tpu.memory_space<vmem>>, vector<1x96xf32>
    %c0_7 = arith.constant 0 : index
    %c0_8 = arith.constant 0 : index
    %5 = vector.load %arg5[%c0_7, %c0_8] : memref<32x32xbf16, #tpu.memory_space<vmem>>, vector<32x32xbf16>
    %c0_9 = arith.constant 0 : index
    %c0_10 = arith.constant 0 : index
    %6 = vector.load %arg6[%c0_9, %c0_10] : memref<1x32xf32, #tpu.memory_space<vmem>>, vector<1x32xf32>
    %c0_11 = arith.constant 0 : index
    %c0_12 = arith.constant 0 : index
    %7 = vector.load %arg7[%c0_11, %c0_12] : memref<1x32xf32, #tpu.memory_space<vmem>>, vector<1x32xf32>
    %c0_13 = arith.constant 0 : index
    %c0_14 = arith.constant 0 : index
    %8 = vector.load %arg8[%c0_13, %c0_14] : memref<1x32xf32, #tpu.memory_space<vmem>>, vector<1x32xf32>
    %cst = arith.constant dense<0.000000e+00> : vector<8x96xf32>
    %9 = tpu.matmul %1, %3, %cst {dimension_numbers = #tpu.dot_dimension_numbers<[1], [0], [0], [1], [0, 0, 1, 1], [], []>} : vector<8x32xbf16>, vector<32x96xbf16>, vector<8x96xf32> -> vector<8x96xf32>
    %10 = vector.broadcast %4 : vector<1x96xf32> to vector<8x96xf32>
    %11 = arith.addf %9, %10 : vector<8x96xf32>
    %12 = vector.extract_strided_slice %11 {offsets = [0, 0], sizes = [8, 8], strides = [1, 1]} : vector<8x96xf32> to vector<8x8xf32>
    %13 = vector.shape_cast %12 : vector<8x8xf32> to vector<1x8x8xf32>
    %14 = vector.extract_strided_slice %11 {offsets = [0, 8], sizes = [8, 8], strides = [1, 1]} : vector<8x96xf32> to vector<8x8xf32>
    %15 = vector.shape_cast %14 : vector<8x8xf32> to vector<1x8x8xf32>
    %16 = vector.extract_strided_slice %11 {offsets = [0, 16], sizes = [8, 8], strides = [1, 1]} : vector<8x96xf32> to vector<8x8xf32>
    %17 = vector.shape_cast %16 : vector<8x8xf32> to vector<1x8x8xf32>
    %18 = vector.extract_strided_slice %11 {offsets = [0, 24], sizes = [8, 8], strides = [1, 1]} : vector<8x96xf32> to vector<8x8xf32>
    %19 = vector.shape_cast %18 : vector<8x8xf32> to vector<1x8x8xf32>
    %20 = tpu.concatenate %13, %15, %17, %19 in 0 : vector<1x8x8xf32>, vector<1x8x8xf32>, vector<1x8x8xf32>, vector<1x8x8xf32> -> vector<4x8x8xf32>
    %21 = arith.truncf %20 : vector<4x8x8xf32> to vector<4x8x8xbf16>
    %22 = vector.extract_strided_slice %11 {offsets = [0, 32], sizes = [8, 8], strides = [1, 1]} : vector<8x96xf32> to vector<8x8xf32>
    %23 = vector.shape_cast %22 : vector<8x8xf32> to vector<1x8x8xf32>
    %24 = vector.extract_strided_slice %11 {offsets = [0, 40], sizes = [8, 8], strides = [1, 1]} : vector<8x96xf32> to vector<8x8xf32>
    %25 = vector.shape_cast %24 : vector<8x8xf32> to vector<1x8x8xf32>
    %26 = vector.extract_strided_slice %11 {offsets = [0, 48], sizes = [8, 8], strides = [1, 1]} : vector<8x96xf32> to vector<8x8xf32>
    %27 = vector.shape_cast %26 : vector<8x8xf32> to vector<1x8x8xf32>
    %28 = vector.extract_strided_slice %11 {offsets = [0, 56], sizes = [8, 8], strides = [1, 1]} : vector<8x96xf32> to vector<8x8xf32>
    %29 = vector.shape_cast %28 : vector<8x8xf32> to vector<1x8x8xf32>
    %30 = tpu.concatenate %23, %25, %27, %29 in 0 : vector<1x8x8xf32>, vector<1x8x8xf32>, vector<1x8x8xf32>, vector<1x8x8xf32> -> vector<4x8x8xf32>
    %31 = arith.truncf %30 : vector<4x8x8xf32> to vector<4x8x8xbf16>
    %32 = vector.extract_strided_slice %11 {offsets = [0, 64], sizes = [8, 8], strides = [1, 1]} : vector<8x96xf32> to vector<8x8xf32>
    %33 = vector.shape_cast %32 : vector<8x8xf32> to vector<1x8x8xf32>
    %34 = vector.extract_strided_slice %11 {offsets = [0, 72], sizes = [8, 8], strides = [1, 1]} : vector<8x96xf32> to vector<8x8xf32>
    %35 = vector.shape_cast %34 : vector<8x8xf32> to vector<1x8x8xf32>
    %36 = vector.extract_strided_slice %11 {offsets = [0, 80], sizes = [8, 8], strides = [1, 1]} : vector<8x96xf32> to vector<8x8xf32>
    %37 = vector.shape_cast %36 : vector<8x8xf32> to vector<1x8x8xf32>
    %38 = vector.extract_strided_slice %11 {offsets = [0, 88], sizes = [8, 8], strides = [1, 1]} : vector<8x96xf32> to vector<8x8xf32>
    %39 = vector.shape_cast %38 : vector<8x8xf32> to vector<1x8x8xf32>
    %40 = tpu.concatenate %33, %35, %37, %39 in 0 : vector<1x8x8xf32>, vector<1x8x8xf32>, vector<1x8x8xf32>, vector<1x8x8xf32> -> vector<4x8x8xf32>
    %41 = arith.truncf %40 : vector<4x8x8xf32> to vector<4x8x8xbf16>
    "tpu.trace_start"() <{level = 10 : i32, message = "gld,gmd->glm"}> : () -> ()
    %cst_15 = arith.constant dense<0.000000e+00> : vector<4x8x8xf32>
    %42 = tpu.matmul %21, %31, %cst_15 {dimension_numbers = #tpu.dot_dimension_numbers<[2], [2], [1], [1], [0, 0, 0, 1, 1, 1], [0], [0]>} : vector<4x8x8xbf16>, vector<4x8x8xbf16>, vector<4x8x8xf32> -> vector<4x8x8xf32>
    "tpu.trace_stop"() : () -> ()
    %cst_16 = arith.constant dense<0xFF800000> : vector<4x8xf32>
    %43 = vector.multi_reduction <maximumf>, %42, %cst_16 [2] : vector<4x8x8xf32> to vector<4x8xf32>
    %44 = vector.shape_cast %43 : vector<4x8xf32> to vector<4x8x1xf32>
    %45 = vector.broadcast %44 : vector<4x8x1xf32> to vector<4x8x8xf32>
    %46 = arith.subf %42, %45 : vector<4x8x8xf32>
    %47 = math.exp %46 : vector<4x8x8xf32>
    %cst_17 = arith.constant dense<0.000000e+00> : vector<4x8xf32>
    %48 = vector.multi_reduction <add>, %47, %cst_17 [2] : vector<4x8x8xf32> to vector<4x8xf32>
    %49 = vector.shape_cast %48 : vector<4x8xf32> to vector<4x8x1xf32>
    %50 = tpu.reciprocal %49 {approx = true} : vector<4x8x1xf32> -> vector<4x8x1xf32>
    %51 = vector.broadcast %50 : vector<4x8x1xf32> to vector<4x8x8xf32>
    %52 = arith.mulf %47, %51 : vector<4x8x8xf32>
    %53 = arith.truncf %52 : vector<4x8x8xf32> to vector<4x8x8xbf16>
    "tpu.trace_start"() <{level = 10 : i32, message = "glm,gmd->gld"}> : () -> ()
    %cst_18 = arith.constant dense<0.000000e+00> : vector<4x8x8xf32>
    %54 = tpu.matmul %53, %41, %cst_18 {dimension_numbers = #tpu.dot_dimension_numbers<[2], [1], [1], [2], [0, 0, 0, 1, 1, 2], [0], [0]>} : vector<4x8x8xbf16>, vector<4x8x8xbf16>, vector<4x8x8xf32> -> vector<4x8x8xf32>
    "tpu.trace_stop"() : () -> ()
    %55 = vector.extract_strided_slice %54 {offsets = [0, 0, 0], sizes = [1, 8, 8], strides = [1, 1, 1]} : vector<4x8x8xf32> to vector<1x8x8xf32>
    %56 = vector.extract_strided_slice %54 {offsets = [1, 0, 0], sizes = [1, 8, 8], strides = [1, 1, 1]} : vector<4x8x8xf32> to vector<1x8x8xf32>
    %57 = vector.extract_strided_slice %54 {offsets = [2, 0, 0], sizes = [1, 8, 8], strides = [1, 1, 1]} : vector<4x8x8xf32> to vector<1x8x8xf32>
    %58 = vector.extract_strided_slice %54 {offsets = [3, 0, 0], sizes = [1, 8, 8], strides = [1, 1, 1]} : vector<4x8x8xf32> to vector<1x8x8xf32>
    %59 = tpu.concatenate %55, %56, %57, %58 in 2 : vector<1x8x8xf32>, vector<1x8x8xf32>, vector<1x8x8xf32>, vector<1x8x8xf32> -> vector<1x8x32xf32>
    %60 = vector.shape_cast %59 : vector<1x8x32xf32> to vector<8x32xf32>
    %61 = arith.truncf %60 : vector<8x32xf32> to vector<8x32xbf16>
    %cst_19 = arith.constant dense<0.000000e+00> : vector<8x32xf32>
    %62 = tpu.matmul %61, %5, %cst_19 {dimension_numbers = #tpu.dot_dimension_numbers<[1], [0], [0], [1], [0, 0, 1, 1], [], []>} : vector<8x32xbf16>, vector<32x32xbf16>, vector<8x32xf32> -> vector<8x32xf32>
    %63 = vector.broadcast %6 : vector<1x32xf32> to vector<8x32xf32>
    %64 = arith.addf %62, %63 : vector<8x32xf32>
    %65 = arith.addf %2, %64 : vector<8x32xf32>
    %cst_20 = arith.constant dense<0.000000e+00> : vector<8xf32>
    %66 = vector.multi_reduction <add>, %65, %cst_20 [1] : vector<8x32xf32> to vector<8xf32>
    %67 = vector.shape_cast %66 : vector<8xf32> to vector<8x1xf32>
    %cst_21 = arith.constant 3.200000e+01 : f32
    %68 = vector.broadcast %cst_21 : f32 to vector<8x1xf32>
    %69 = arith.divf %67, %68 : vector<8x1xf32>
    %70 = vector.broadcast %69 : vector<8x1xf32> to vector<8x32xf32>
    %71 = arith.subf %65, %70 : vector<8x32xf32>
    %72 = arith.mulf %71, %71 : vector<8x32xf32>
    %cst_22 = arith.constant dense<0.000000e+00> : vector<8xf32>
    %73 = vector.multi_reduction <add>, %72, %cst_22 [1] : vector<8x32xf32> to vector<8xf32>
    %74 = vector.shape_cast %73 : vector<8xf32> to vector<8x1xf32>
    %cst_23 = arith.constant 3.200000e+01 : f32
    %75 = vector.broadcast %cst_23 : f32 to vector<8x1xf32>
    %76 = arith.divf %74, %75 : vector<8x1xf32>
    %77 = vector.broadcast %69 : vector<8x1xf32> to vector<8x32xf32>
    %78 = arith.subf %65, %77 : vector<8x32xf32>
    %cst_24 = arith.constant 9.99999974E-6 : f32
    %79 = vector.broadcast %cst_24 : f32 to vector<8x1xf32>
    %80 = arith.addf %76, %79 : vector<8x1xf32>
    %81 = math.rsqrt %80 : vector<8x1xf32>
    %82 = vector.broadcast %81 : vector<8x1xf32> to vector<8x32xf32>
    %83 = arith.mulf %78, %82 : vector<8x32xf32>
    %84 = vector.broadcast %7 : vector<1x32xf32> to vector<8x32xf32>
    %85 = arith.mulf %83, %84 : vector<8x32xf32>
    %86 = vector.broadcast %8 : vector<1x32xf32> to vector<8x32xf32>
    %87 = arith.addf %85, %86 : vector<8x32xf32>
    %c0_25 = arith.constant 0 : index
    %c0_26 = arith.constant 0 : index
    %88 = vector.load %arg9[%c0_25, %c0_26] : memref<8x32xf32, #tpu.memory_space<vmem>>, vector<8x32xf32>
    tpu.vector_store %arg9[%c0_25, %c0_26], %87 {strides = array<i32>} : memref<8x32xf32, #tpu.memory_space<vmem>>, vector<8x32xf32>,
    return
  }
  func.func @transform_0(%arg0: i32) -> (i32, i32) {
    %c0_i32 = arith.constant 0 : i32
    %c0_i32_0 = arith.constant 0 : i32
    return %arg0, %c0_i32 : i32, i32
  }
  func.func @transform_1(%arg0: i32) -> (i32, i32) {
    %c0_i32 = arith.constant 0 : i32
    %c0_i32_0 = arith.constant 0 : i32
    return %arg0, %c0_i32 : i32, i32
  }
  func.func @transform_2(%arg0: i32) -> (i32, i32) {
    %c0_i32 = arith.constant 0 : i32
    %c0_i32_0 = arith.constant 0 : i32
    %c0_i32_1 = arith.constant 0 : i32
    return %c0_i32, %c0_i32_0 : i32, i32
  }
  func.func @transform_3(%arg0: i32) -> (i32, i32) {
    %c0_i32 = arith.constant 0 : i32
    %c0_i32_0 = arith.constant 0 : i32
    %c0_i32_1 = arith.constant 0 : i32
    return %c0_i32, %c0_i32_0 : i32, i32
  }
  func.func @transform_4(%arg0: i32) -> (i32, i32) {
    %c0_i32 = arith.constant 0 : i32
    %c0_i32_0 = arith.constant 0 : i32
    %c0_i32_1 = arith.constant 0 : i32
    return %c0_i32, %c0_i32_0 : i32, i32
  }
  func.func @transform_5(%arg0: i32) -> (i32, i32) {
    %c0_i32 = arith.constant 0 : i32
    %c0_i32_0 = arith.constant 0 : i32
    %c0_i32_1 = arith.constant 0 : i32
    return %c0_i32, %c0_i32_0 : i32, i32
  }
  func.func @transform_6(%arg0: i32) -> (i32, i32) {
    %c0_i32 = arith.constant 0 : i32
    %c0_i32_0 = arith.constant 0 : i32
    %c0_i32_1 = arith.constant 0 : i32
    return %c0_i32, %c0_i32_0 : i32, i32
  }
  func.func @transform_7(%arg0: i32) -> (i32, i32) {
    %c0_i32 = arith.constant 0 : i32
    %c0_i32_0 = arith.constant 0 : i32
    %c0_i32_1 = arith.constant 0 : i32
    return %c0_i32, %c0_i32_0 : i32, i32
  }
  func.func @transform_8(%arg0: i32) -> (i32, i32) {
    %c0_i32 = arith.constant 0 : i32
    %c0_i32_0 = arith.constant 0 : i32
    return %arg0, %c0_i32 : i32, i32
  }
}

</mosaic_0001>

<bundles_post_ra>
// kernel: tpu_custom_call.1
= control target key start
LH: loop header
LB: loop body
LE: loop exit
PB: predicated region body
PF: predicated region fallthrough
CT: control target
= control target key end

     0   :  { %s2008_s0 = inlined_call_operand.hbm [shape: f32[16,32], index: 0, kind: input, shape index: {}]   ;;  %s2009_s1 = inlined_call_operand.hbm [shape: f32[16,32], index: 1, kind: input, shape index: {}]   ;;  %s2010_s2 = inlined_call_operand.hbm [shape: bf16[32,96], index: 2, kind: input, shape index: {}]   ;;  %s2011_s3 = inlined_call_operand.vmem [shape: f32[1,96], index: 3, kind: input, shape index: {}]   ;;  %s2012_s4 = inlined_call_operand.hbm [shape: bf16[32,32], index: 4, kind: input, shape index: {}]   ;;  %s2013_s5 = inlined_call_operand.vmem [shape: f32[1,32], index: 5, kind: input, shape index: {}]   ;;  %s2014_s6 = inlined_call_operand.vmem [shape: f32[1,32], index: 6, kind: input, shape index: {}]   ;;  %s2015_s7 = inlined_call_operand.vmem [shape: f32[1,32], index: 7, kind: input, shape index: {}]   ;;  %s2016_s8 = inlined_call_operand.hbm [shape: f32[16,32], index: 8, kind: output, shape index: {}]  }
   0x1   :  { %2024 = sst [smem:[#allocation19_spill]] %s2010_s2 }
   0x2   :  { %2025 = sst [smem:[#allocation20_spill]] %s2012_s4 }
   0x3   :  { %13 = vsyncpa [#allocation3], 0 }
   0x4   :  { %15 = vsyncpa [#allocation3 + $0x1], 0 }
   0x5   :  { %16 = vsyncpa [#allocation6], 0 }
   0x6   :  { %18 = vsyncpa [#allocation6 + $0x1], 0 }
   0x7   :  { %19 = vsyncpa [#allocation9], 0 }
   0x8   :  { %20 = vsyncpa [#allocation4], 0 }
   0x9   :  { %22 = vsyncpa [#allocation4 + $0x1], 0  ;;  %s1639_s27 = smov 0   ;;  %s1641_s28 = smov 0  }
   0xa   :  { %s1643_s29 = smov 0   ;;  %s1645_s30 = smov 0  }
   0xb LB: > { %2026 = sst [smem:[#allocation16_spill]] %s1571_s29  ;;  %s1660_s9 = sadd.s32 4294967295, %s1575_s30   ;;  %s1575_s30 = sphi %s1645_s30, %s2047_s30   ;;  %s1571_s29 = sphi %s1643_s29, %s2049_s29   ;;  %s1567_s28 = sphi %s1641_s28, %s2051_s28   ;;  %s1563_s27 = sphi %s1639_s27, %s2050_s27  }
   0xc   : > { %s1152_s10 = sadd.s32 4294967294, %s1575_s30   ;;  %p48_p0 = scmp.ne.s32.totalorder %s1567_s28, %s1563_s27 }
   0xd   : > { %p2017_p1 = scmp.eq.s32.totalorder %s1660_s9, 0  ;;  %p230_p3 = scmp.eq.s32.totalorder %s1152_s10, 1 }
   0xe   : > { %p1153_p5 = scmp.ge.s32.totalorder %s1575_s30, 1  ;;  %p237_p7 = scmp.lt.s32.totalorder %s1575_s30, 3 }
   0xf   : > { %p1669_p4 = por %p2017_p1, %p48_p0  ;;  %p1674_p6 = por %p230_p3, %p48_p0 }
  0x10   : > { %p1679_p8 = pnand %p1153_p5, %p237_p7  ;;  %s1577_s14 = smov [#allocation7]  }
  0x11   : > { %s2027_s11 = scalar_select %p1669_p4, 1, 0 }
  0x12   : > { %s2028_s12 = scalar_select %p1674_p6, 1, 0 }
  0x13   : > { %s2029_s13 = scalar_select %p1679_p8, 1, 0 }
  0x14   : > { %s249_s15 = sshll.u32 %s1577_s14, 4  ;;  %p1289_p9 = pneg %p1679_p8  ;;  %s1683_s15 = int_to_ptr.vmem [resolvable:$true] %s249_s15 }
  0x15   : > { %s1578_s17 = smov [#allocation8]   ;;  %s2031_s2 = sld [smem:[#allocation19_spill]] }
  0x16   : > { %p1690_p11 = pnand %p1289_p9, %p2017_p1  ;;  %s265_s18 = sshll.u32 %s1578_s17, 4  ;;  %s1694_s18 = int_to_ptr.vmem [resolvable:$true] %s265_s18 }
  0x18   : > { %p1383_p13 = pneg %p1690_p11 }
  0x1b   : > { %s1381_s21 = scalar_lea.hbm %s2031_s2, 256 }
  0x1c   : > { %p1382_p12 = scmp.ne.s32.totalorder %s2031_s2, %s1381_s21  ;;  %p1388_p5 = scmp.lt.u32.totalorder %s1381_s21, %s2031_s2 }
  0x1e   : > { %p1384_p0 = pnand %p1383_p13, %p1382_p12 }
  0x20   : > { %p1385_p3 = pneg %p1384_p0 }
  0x22   : > { %p1390_p7 = pnand %p1388_p5, %p1385_p3 }
  0x24   : > { %1393 = shalt.err (!%p1390_p7)
}
  0x25   : > { %s1394_s26 = scalar_lea.vmem %s1683_s15, 256  ;;  %p1402_p2 = scmp.lt.s32.totalorder %s1683_s15, %s1683_s15 }
  0x26   : > { %p1395_p9 = scmp.ne.s32.totalorder %s1683_s15, %s1394_s26  ;;  %p1403_p12 = scmp.lt.s32.totalorder %s1394_s26, %s1394_s26 }
  0x28   : > { %p1397_p10 = pnand %p1395_p9, %p1383_p13  ;;  %p1404_p0 = por %p1403_p12, %p1402_p2 }
  0x2a   : > { %p1398_p1 = pneg %p1397_p10 }
  0x2c   : > { %p1405_p6 = pnand %p1404_p0, %p1398_p1 }
  0x2e   : > { %1408 = shalt.err (!%p1405_p6)
}
  0x2f   : > { %s1579_s10 = smov 64   ;;  %s1580_s14 = smov 4  }
  0x30   : > { %1292 = dma.hbm_to_vmem [thread:$0]  (!%p1690_p11), %s2031_s2, 256, %s1683_s15, [#allocation6], %s1579_s10, %s1579_s10, %s1580_s14  }
  0x31   : > { %s2032_s4 = sld [smem:[#allocation20_spill]] }
  0x37   : > { %s1409_s22 = scalar_lea.hbm %s2032_s4, 256 }
  0x38   : > { %p1410_p2 = scmp.ne.s32.totalorder %s2032_s4, %s1409_s22  ;;  %p1416_p10 = scmp.lt.u32.totalorder %s1409_s22, %s2032_s4 }
  0x3a   : > { %p1412_p1 = pnand %p1410_p2, %p1383_p13 }
  0x3c   : > { %p1413_p6 = pneg %p1412_p1 }
  0x3e   : > { %p1418_p3 = pnand %p1416_p10, %p1413_p6 }
  0x40   : > { %1421 = shalt.err (!%p1418_p3)
}
  0x41   : > { %s1422_s15 = scalar_lea.vmem %s1694_s18, 256  ;;  %p1430_p12 = scmp.lt.s32.totalorder %s1694_s18, %s1694_s18 }
  0x42   : > { %p1423_p5 = scmp.ne.s32.totalorder %s1694_s18, %s1422_s15  ;;  %p1431_p0 = scmp.lt.s32.totalorder %s1422_s15, %s1422_s15 }
  0x44   : > { %p1425_p7 = pnand %p1423_p5, %p1383_p13  ;;  %p1432_p2 = por %p1431_p0, %p1430_p12 }
  0x46   : > { %p1426_p9 = pneg %p1425_p7 }
  0x48   : > { %p1433_p1 = pnand %p1432_p2, %p1426_p9 }
  0x4a   : > { %1436 = shalt.err (!%p1433_p1)
}
  0x4b   : > { %1295 = dma.hbm_to_vmem [thread:$0]  (!%p1690_p11), %s2032_s4, 256, %s1694_s18, [#allocation9], %s1579_s10, %s1579_s10, %s1580_s14  }
  0x4c   : > { %s1749_s20 = sadd.s32 1, %s1575_s30   ;;  %s35_s16 = sadd.s32 1, %s1571_s29 }
  0x4d   : > { %2033 = sst [smem:[#allocation17_spill]] %s1749_s20  ;;  %s32_s21 = ssub.s32 %s1575_s30, %s1749_s20 }
  0x4e   : > { %p42_p13 = scmp.ne.s32.totalorder %s1571_s29, %s1567_s28  ;;  %p33_p6 = scmp.eq.s32.totalorder %s32_s21, 0 }
  0x4f   : > { %p43_p10 = scmp.eq.s32.totalorder %s1575_s30, 0  ;;  %p2034_p3 = scmp.eq.s32.totalorder %s1660_s9, 1 }
  0x50   : > { %p1309_p7 = scmp.lt.s32.totalorder %s1575_s30, 2  ;;  %s288_s24 = sand.u32 1, %s1571_s29  }
  0x51   : > { %p1759_p5 = por %p2034_p3, %p42_p13  ;;  %p44_p9 = por %p43_p10, %p42_p13 }
  0x52   : > { %s1765_s23 = scalar_select %p33_p6, %s1571_s29, %s35_s16  }
  0x53   : > { %s2035_s22 = scalar_select %p1759_p5, 1, 0 }
  0x54   : > { %2036 = sst [smem:[#allocation18_spill]] %s1765_s23  ;;  %s1768_s18 = sshll.u32 %s288_s24, 3 }
  0x55   : > { %s1158_s10 = sshll.u32 %s1575_s30, 7  ;;  %s292_s15 = scalar_lea.vmem [#allocation2], %s1768_s18 }
  0x56   : > { %s1774_s26 = scalar_lea.hbm %s2008_s0, %s1158_s10  ;;  %s299_s17 = sshll.u32 %s292_s15, 4  ;;  %s1777_s17 = int_to_ptr.vmem [resolvable:$true] %s299_s17 }
  0x57   : > { %p1779_p11 = pnand %p1309_p7, %p44_p9  ;;  %s1786_s14 = scalar_lea.hbm %s2009_s1, %s1158_s10 }
  0x58   : > { %s306_s25 = sand.u32 1, %s1575_s30   ;;  %s289_s2 = scalar_lea.sflag [#allocation3], %s288_s24 }
  0x59   : > { %s1437_s4 = scalar_lea.hbm %s1774_s26, 128  ;;  %p1439_p0 = pneg %p1779_p11 }
  0x5a   : > { %p1438_p12 = scmp.ne.s32.totalorder %s1774_s26, %s1437_s4  ;;  %s1442_s29 = scalar_lea.hbm %s2008_s0, 256 }
  0x5b   : > { %p1443_p13 = scmp.lt.u32.totalorder %s1774_s26, %s2008_s0  ;;  %p1444_p6 = scmp.lt.u32.totalorder %s1442_s29, %s1437_s4 }
  0x5c   : > { %p1440_p2 = pnand %p1439_p0, %p1438_p12  ;;  %p1446_p3 = scmp.lt.u32.totalorder %s1437_s4, %s1774_s26 }
  0x5d   : > { %p1445_p10 = por %p1444_p6, %p1443_p13 }
  0x5e   : > { %p1441_p1 = pneg %p1440_p2 }
  0x5f   : > { %p1447_p7 = por %p1446_p3, %p1445_p10 }
  0x61   : > { %p1448_p9 = pnand %p1447_p7, %p1441_p1 }
  0x63   : > { %1451 = shalt.err (!%p1448_p9)
}
  0x64   : > { %s1452_s24 = scalar_lea.vmem %s1777_s17, 128  ;;  %s1581_s23 = smov [#allocation2]  }
  0x65   : > { %p1453_p12 = scmp.ne.s32.totalorder %s1777_s17, %s1452_s24  ;;  %s1457_s10 = sshll.u32 %s1581_s23, 4  ;;  %s1458_s10 = int_to_ptr.vmem [resolvable:$false] %s1457_s10 }
  0x66   : > { %s1459_s20 = scalar_lea.vmem %s1458_s10, 256  ;;  %p1460_p4 = scmp.lt.s32.totalorder %s1777_s17, %s1458_s10 }
  0x67   : > { %p1455_p2 = pnand %p1453_p12, %p1439_p0  ;;  %p1461_p13 = scmp.lt.s32.totalorder %s1459_s20, %s1452_s24 }
  0x69   : > { %p1456_p5 = pneg %p1455_p2  ;;  %p1462_p6 = por %p1461_p13, %p1460_p4 }
  0x6b   : > { %p1463_p10 = pnand %p1462_p6, %p1456_p5 }
  0x6d   : > { %1466 = shalt.err (!%p1463_p10)
}
  0x6e   : > { %1299 = dma.hbm_to_vmem [thread:$0]  (!%p1779_p11), %s1774_s26, 128, %s1777_s17, %s289_s2  }
  0x6f   : > { %s310_s4 = scalar_lea.vmem [#allocation5], %s1768_s18  ;;  %s307_s21 = scalar_lea.sflag [#allocation6], %s306_s25 }
  0x70   : > { %s317_s29 = sshll.u32 %s310_s4, 4  ;;  %s1467_s15 = scalar_lea.hbm %s1786_s14, 128  ;;  %s318_s29 = int_to_ptr.vmem [resolvable:$true] %s317_s29 }
  0x71   : > { %p1468_p4 = scmp.ne.s32.totalorder %s1786_s14, %s1467_s15  ;;  %s1472_s23 = scalar_lea.hbm %s2009_s1, 256 }
  0x72   : > { %p1473_p3 = scmp.lt.u32.totalorder %s1786_s14, %s2009_s1  ;;  %p1474_p7 = scmp.lt.u32.totalorder %s1472_s23, %s1467_s15 }
  0x73   : > { %p1470_p5 = pnand %p1468_p4, %p1439_p0  ;;  %p1476_p12 = scmp.lt.u32.totalorder %s1467_s15, %s1786_s14 }
  0x74   : > { %p1475_p9 = por %p1474_p7, %p1473_p3 }
  0x75   : > { %p1471_p1 = pneg %p1470_p5 }
  0x76   : > { %p1477_p2 = por %p1476_p12, %p1475_p9 }
  0x78   : > { %p1478_p13 = pnand %p1477_p2, %p1471_p1 }
  0x7a   : > { %1481 = shalt.err (!%p1478_p13)
}
  0x7b   : > { %s1482_s2 = scalar_lea.vmem %s318_s29, 128  ;;  %s1582_s18 = smov [#allocation5]  }
  0x7c   : > { %p1483_p6 = scmp.ne.s32.totalorder %s318_s29, %s1482_s2  ;;  %s1487_s26 = sshll.u32 %s1582_s18, 4  ;;  %s1488_s26 = int_to_ptr.vmem [resolvable:$false] %s1487_s26 }
  0x7d   : > { %s1489_s17 = scalar_lea.vmem %s1488_s26, 256  ;;  %p1490_p5 = scmp.lt.s32.totalorder %s318_s29, %s1488_s26 }
  0x7e   : > { %p1485_p10 = pnand %p1483_p6, %p1439_p0  ;;  %p1491_p8 = scmp.lt.s32.totalorder %s1489_s17, %s1482_s2 }
  0x80   : > { %p1486_p4 = pneg %p1485_p10  ;;  %p1492_p3 = por %p1491_p8, %p1490_p5 }
  0x82   : > { %p1493_p7 = pnand %p1492_p3, %p1486_p4 }
  0x84   : > { %1496 = shalt.err (!%p1493_p7)
}
  0x85   : > { %1302 = dma.hbm_to_vmem [thread:$0]  (!%p1779_p11), %s1786_s14, 128, %s318_s29, %s307_s21  }
  0x86   : > { %p2038_p1 = scmp.ne.s32.totalorder %s2029_s13, 0 }
  0x87   : > { %s1839_s25 = sand.u32 (!%p2038_p1), 1, %s1567_s28   ;;  %p2039_p8 = scmp.ne.s32.totalorder (!%p2038_p1), %s2027_s11, 0 }
  0x88   : > { %326 = sbr.rel (%p2038_p1) target bundleno = 2027 (0x7eb), region = 52  ;;  %s1842_s4 = sshll.u32 (!%p2038_p1), %s1839_s25, 3 }
  0x89   : > { %s329_s15 = scalar_lea.sflag (!%p2038_p1), [#allocation3], %s1839_s25  ;;  %s332_s16 = scalar_lea.vmem (!%p2038_p1), [#allocation2], %s1842_s4 }
  0x8f   : > { %1542 = dma.done.wait (%p2039_p8), %s329_s15, 128  }
  0x90   : > { %1544 = vsyncadd (%p2039_p8), %s329_s15, 4294967168  ;;  %s337_s13 = sand.u32 1, %s1660_s9   ;;  %s341_s14 = scalar_lea.vmem [#allocation5], %s1842_s4 }
  0x91   : > { %s338_s19 = scalar_lea.sflag [#allocation6], %s337_s13 }
  0x92   : > { %1546 = dma.done.wait (%p2039_p8), %s338_s19, 128  }
  0x93   : > { %1548 = vsyncadd (%p2039_p8), %s338_s19, 4294967168  ;;  %p2040_p11 = scmp.eq.s32.totalorder %s1660_s9, 0 }
  0x95   : > { %1550 = dma.done.wait (%p2040_p11), [#allocation6], 256   ;;  %p2041_p0 = pmov %p2040_p11 }
  0x97   : > { %1552 = vsyncadd (%p2041_p0), [#allocation6], 4294967040  ;;  %p2042_p9 = pmov %p2041_p0 }
  0x98   : > { %p2043_p12 = pmov %p2041_p0 }
  0x99   : > { %1554 = dma.done.wait (%p2042_p9), [#allocation9], 256  }
  0x9a   : > { %1556 = vsyncadd (%p2043_p12), [#allocation9], 4294967040  ;;  %v1583_v0 = vmov 0.0   ;;  %vm1584_vm0 = vmmov 0   ;;  %v1359_v1 = vld [vmem:[#allocation7] sm:$0xff]   ;;  %v1360_v2 = vld [vmem:[#allocation7 + $0x8] sm:$0xff]  }
  0x9b   : > { %1211 = vmatprep.subr.bf16.mxu0 %v1583_v0  ;;  %1215 = vmatprep.mubr.msk.bf16.mxu0 %vm1584_vm0, %v1583_v0  ;;  %v388_v3 = vld [vmem:[%s332_s16] sm:$0xff]  ;;  %vm421_vm1 = vcmask 261120   ;;  %s1585_s21 = smov 104   ;;  %s1586_s24 = smov 120   ;;  %vm482_vm2 = vcmask 64512   ;;  %vm729_vm3 = vcmask 1043456  }
  0x9c   : > { %1219 = vmatprep.subr.bf16.mxu1 %v1583_v0  ;;  %1221 = vmatprep.mubr.msk.bf16.mxu1 %vm1584_vm0, %v1583_v0  ;;  %v389_v4 = vpack.c.bf16 %v388_v3, %v388_v3  ;;  %v1167_v5 = vld [vmem:[%s2011_s3] ss:$0 sm:$0xff]  ;;  %s1587_s23 = smov 112   ;;  %s1588_s10 = smov 96   ;;  %vm930_vm4 = vcmask 130048   ;;  %vm932_vm5 = vcmask 195584  }
  0x9d   : > { %1212 = vmatpush3.bf16.msra.mxu0 %v1359_v1  ;;  %s1589_s20 = smov 64   ;;  %s1590_s2 = smov 8  }
  0x9e   : > { %1213 = vmatprep.subr.bf16.mxu0 %v1583_v0  ;;  %s1591_s18 = smov 16   ;;  %s1592_s26 = smov 24  }
  0x9f   : > { %s1186_s11 = sshll.u32 %s1660_s9, 7  ;;  %s386_s29 = scalar_lea.vmem [#allocation10], %s1842_s4 }
  0xa0   : > { %p2044_p13 = scmp.ne.s32.totalorder %s2035_s22, 0  ;;  %s1593_s9 = smov [#allocation10]  }
  0xa1   : > { %1214 = vmatpush3.bf16.msra.mxu0 %v1360_v2  ;;  %s1501_s4 = sshll.u32 %s1593_s9, 4  ;;  %s1502_s4 = int_to_ptr.vmem [resolvable:$false] %s1501_s4 }
  0xa2   : > { %1225 = vmatprep.subr.bf16.mxu0 %v1583_v0 }
  0xa4   : > { %1216 = vmatmul.mubr.msk.bf16.vlgmr.msra.gmra.mrb[0].mxu0 %vm421_vm1, %v389_v4 }
  0xa5   : > { %1227 = vmatprep.mubr.msk.bf16.mxu0 %vm1584_vm0, %v1583_v0 }
 0x177   : > { %v459_v6 = vpop.f32.mrb[0].mxu0 }
 0x178   : > { %v460_v7 = vadd.f32 %v1167_v5, %v459_v6  ;;  %v1217_v8 = vpop.f32.mrb[1].mxu0 }
 0x179   : > { %v462_v9 = vpop.f32.mrb[2].mxu0 }
 0x17a   : > { %472 = vrot.lane.b32.xlu1 %v460_v7, %s1585_s21  ;;  %466 = vrot.lane.b32.xlu0 %v460_v7, %s1586_s24  ;;  %v1218_v10 = vpop.f32.mrb[3].mxu0  ;;  %v1878_v11 = vpack.c.bf16 %v460_v7, %v460_v7  ;;  %s1040_s21 = sshll.u32 %s386_s29, 4  ;;  %s1965_s21 = int_to_ptr.vmem [resolvable:$true] %s1040_s21 }
 0x17b   : > { %p1504_p4 = scmp.lt.s32.totalorder %s1965_s21, %s1502_s4 }
 0x17e   : > { %469 = vrot.lane.b32.xlu0 %v460_v7, %s1587_s23  ;;  %480 = vrot.lane.b32.xlu1 %v1878_v11, %s1588_s10 }
 0x1ec   : > { %v473_v12 = vpop.permute.xlu1 %472  ;;  %v467_v13 = vpop.permute.xlu0 %466 }
 0x1ed   : > { %v476_v14 = vpack.c.bf16 %v467_v13, %v467_v13  ;;  %v1881_v17 = vpack.c.bf16 %v473_v12, %v473_v12 }
 0x1ef   : > { %530 = vrot.lane.b32.xlu0 %v476_v14, %s1588_s10 }
 0x1f0   : > { %v470_v15 = vpop.permute.xlu0 %469  ;;  %v481_v16 = vpop.permute.xlu1 %480 }
 0x1f1   : > { %v1883_v18 = vpack.c.bf16 %v470_v15, %v470_v15  ;;  %v487_v19 = vsel %vm482_vm2, %v481_v16, 0 }
 0x1f2   : > { %1220 = vmatpush3.bf16.xpose.msra.mxu1 %v487_v19 }
 0x1f3   : > { %628 = vrot.lane.b32.xlu0 %v1881_v17, %s1588_s10  ;;  %579 = vrot.lane.b32.xlu1 %v1883_v18, %s1588_s10  ;;  %s1963_s10 = scalar_lea.hbm %s2016_s8, %s1186_s11 }
 0x1f4   : > { %1231 = vmatprep.subr.bf16.mxu1 %v1583_v0 }
 0x1f9   : > { %1222 = vmatmul.mubr.msk.bf16.vlgmr.msra.gmra.mrb[0].mxu1 %vm482_vm2, %v1878_v11 }
 0x1fa   : > { %1233 = vmatprep.mubr.msk.bf16.mxu1 %vm1584_vm0, %v1583_v0 }
 0x261   : > { %v531_v20 = vpop.permute.xlu0 %530 }
 0x262   : > { %v536_v21 = vsel %vm482_vm2, %v531_v20, 0 }
 0x263   : > { %1226 = vmatpush3.bf16.xpose.msra.mxu0 %v536_v21 }
 0x264   : > { %1237 = vmatprep.subr.bf16.mxu0 %v1583_v0 }
 0x265   : > { %v580_v22 = vpop.permute.xlu1 %579  ;;  %v629_v24 = vpop.permute.xlu0 %628 }
 0x266   : > { %v585_v23 = vsel %vm482_vm2, %v580_v22, 0  ;;  %v634_v25 = vsel %vm482_vm2, %v629_v24, 0 }
 0x267   : > { %1232 = vmatpush3.bf16.xpose.msra.mxu1 %v585_v23 }
 0x268   : > { %1243 = vmatprep.subr.bf16.mxu1 %v1583_v0 }
 0x26a   : > { %1228 = vmatmul.mubr.msk.bf16.vlgmr.msra.gmra.mrb[4].mxu0 %vm482_vm2, %v476_v14 }
 0x26b   : > { %1238 = vmatpush3.bf16.xpose.msra.mxu0 %v634_v25  ;;  %1239 = vmatprep.mubr.msk.bf16.mxu0 %vm1584_vm0, %v1583_v0 }
 0x26c   : > { %1249 = vmatprep.subr.bf16.mxu0 %v1583_v0 }
 0x26e   : > { %1234 = vmatmul.mubr.msk.bf16.vlgmr.msra.gmra.mrb[4].mxu1 %vm482_vm2, %v1883_v18 }
 0x26f   : > { %1245 = vmatprep.mubr.msk.bf16.mxu1 %vm1584_vm0, %v1583_v0 }
 0x272   : > { %1240 = vmatmul.mubr.msk.bf16.vlgmr.msra.gmra.mrb[8].mxu0 %vm482_vm2, %v1881_v17 }
 0x273   : > { %1251 = vmatprep.mubr.msk.bf16.mxu0 %vm1584_vm0, %v1583_v0 }
 0x2cc   : > { %v523_v26 = vpop.f32.mrb[0].mxu1 }
 0x2cd   : > { %v1223_v27 = vpop.f32.mrb[1].mxu1  ;;  %v676_v28 = vsel %vm482_vm2, %v523_v26, -inf }
 0x2ce   : > { %677 = vmax.xlane.f32.xlu1 %v676_v28  ;;  %v526_v29 = vpop.f32.mrb[2].mxu1 }
 0x2cf   : > { %v1224_v30 = vpop.f32.mrb[3].mxu1 }
 0x33d   : > { %v572_v31 = vpop.f32.mrb[4].mxu0 }
 0x33e   : > { %v1229_v32 = vpop.f32.mrb[5].mxu0  ;;  %v679_v33 = vsel %vm482_vm2, %v572_v31, -inf }
 0x33f   : > { %680 = vmax.xlane.f32.xlu0 %v679_v33  ;;  %v575_v34 = vpop.f32.mrb[6].mxu0  ;;  %v1362_v32 = vld [vmem:[#allocation8 + $0x8] sm:$0xff]  }
 0x340   : > { %v1230_v35 = vpop.f32.mrb[7].mxu0 }
 0x341   : > { %v621_v36 = vpop.f32.mrb[4].mxu1 }
 0x342   : > { %v1235_v37 = vpop.f32.mrb[5].mxu1  ;;  %v682_v38 = vsel %vm482_vm2, %v621_v36, -inf }
 0x343   : > { %v624_v39 = vpop.f32.mrb[6].mxu1  ;;  %683 = vmax.xlane.f32.xlu0 %v682_v38 }
 0x344   : > { %v1236_v40 = vpop.f32.mrb[7].mxu1 }
 0x345   : > { %v670_v41 = vpop.f32.mrb[8].mxu0 }
 0x346   : > { %v1241_v42 = vpop.f32.mrb[9].mxu0  ;;  %v685_v43 = vsel %vm482_vm2, %v670_v41, -inf }
 0x347   : > { %686 = vmax.xlane.f32.xlu1 %v685_v43  ;;  %v673_v44 = vpop.f32.mrb[10].mxu0 }
 0x348   : > { %v1242_v45 = vpop.f32.mrb[11].mxu0 }
 0x358   : > { %773 = vrot.lane.b32.xlu1 %v476_v14, %s1589_s20 }
 0x359   : > { %724 = vrot.lane.b32.xlu0 %v1878_v11, %s1589_s20 }
 0x35b   : > { %v678_v46 = vpop.xlane.xlu1 %677 }
 0x35c   : > { %v688_v47 = vsub.f32 %v523_v26, %v678_v46 }
 0x35e   : > { %v692_v48 = vmul.f32 1.442695, %v688_v47 }
 0x360   : > { %1363 = vpow2.f32 %v692_v48 }
 0x36a   : > { %v1364_v49 = vpop.eup %1363 }
 0x36b   : > { %v700_v50 = vsel %vm482_vm2, %v1364_v49, 0.0 }
 0x378   : > { %701 = vadd.xlane.f32.xlu0 %v700_v50 }
 0x3cc   : > { %v681_v51 = vpop.xlane.xlu0 %680 }
 0x3cd   : > { %v689_v52 = vsub.f32 %v572_v31, %v681_v51  ;;  %v1361_v31 = vld [vmem:[#allocation8] sm:$0xff]   ;;  %v1179_v51 = vld [vmem:[%s2013_s5] ss:$0 sm:$0xff] }
 0x3cf   : > { %v694_v53 = vmul.f32 1.442695, %v689_v52 }
 0x3d0   : > { %v684_v54 = vpop.xlane.xlu0 %683 }
 0x3d1   : > { %1365 = vpow2.f32 %v694_v53  ;;  %v690_v55 = vsub.f32 %v621_v36, %v684_v54  ;;  %v390_v53 = vld [vmem:[%s341_s14] sm:$0xff] }
 0x3d3   : > { %v696_v56 = vmul.f32 1.442695, %v690_v55 }
 0x3d4   : > { %v725_v57 = vpop.permute.xlu0 %724  ;;  %v687_v58 = vpop.xlane.xlu1 %686 }
 0x3d5   : > { %1367 = vpow2.f32 %v696_v56  ;;  %v731_v59 = vsel %vm729_vm3, %v725_v57, 0  ;;  %v691_v60 = vsub.f32 %v670_v41, %v687_v58 }
 0x3d6   : > { %1244 = vmatpush3.bf16.msra.mxu1 %v731_v59 }
 0x3d7   : > { %v698_v61 = vmul.f32 1.442695, %v691_v60  ;;  %1255 = vmatprep.subr.bf16.mxu1 %v1583_v0 }
 0x3d8   : > { %v774_v62 = vpop.permute.xlu1 %773 }
 0x3d9   : > { %1369 = vpow2.f32 %v698_v61  ;;  %v779_v63 = vsel %vm729_vm3, %v774_v62, 0 }
 0x3da   : > { %1250 = vmatpush3.bf16.msra.mxu0 %v779_v63 }
 0x3db   : > { %v1366_v1 = vpop.eup %1365  ;;  %1261 = vmatprep.subr.bf16.mxu0 %v1583_v0 }
 0x3dc   : > { %v703_v2 = vsel %vm482_vm2, %v1366_v1, 0.0 }
 0x3dd   : > { %704 = vadd.xlane.f32.xlu1 %v703_v2 }
 0x3df   : > { %v1368_v3 = vpop.eup %1367 }
 0x3e0   : > { %v706_v4 = vsel %vm482_vm2, %v1368_v3, 0.0 }
 0x3e1   : > { %707 = vadd.xlane.f32.xlu0 %v706_v4 }
 0x3e3   : > { %v1370_v5 = vpop.eup %1369 }
 0x3e4   : > { %v709_v6 = vsel %vm482_vm2, %v1370_v5, 0.0 }
 0x3e5   : > { %710 = vadd.xlane.f32.xlu1 %v709_v6  ;;  %v1183_v6 = vld [vmem:[%s2014_s6] ss:$0 sm:$0xff] }
 0x3f6   : > { %821 = vrot.lane.b32.xlu1 %v1883_v18, %s1589_s20 }
 0x3f7   : > { %869 = vrot.lane.b32.xlu0 %v1881_v17, %s1589_s20  ;;  %s1027_s20 = scalar_lea.sflag [#allocation4], %s1839_s25 }
 0x405   : > { %v702_v7 = vpop.xlane.xlu0 %701 }
 0x406   : > { %1371 = vrcp.f32 %v702_v7 }
 0x410   : > { %v1372_v8 = vpop.eup %1371 }
 0x411   : > { %v716_v9 = vmul.f32 %v1372_v8, %v1364_v49  ;;  %v1184_v8 = vld [vmem:[%s2015_s7] ss:$0 sm:$0xff] }
 0x413   : > { %v720_v10 = vpack.c.bf16 %v716_v9, %v716_v9 }
 0x415   : > { %1246 = vmatmul.mubr.msk.bf16.vlgmr.msra.gmra.mrb[8].mxu1 %vm482_vm2, %v720_v10 }
 0x416   : > { %1257 = vmatprep.mubr.msk.bf16.mxu1 %vm1584_vm0, %v1583_v0 }
 0x46a   : > { %v705_v11 = vpop.xlane.xlu1 %704 }
 0x46b   : > { %1373 = vrcp.f32 %v705_v11 }
 0x46e   : > { %v708_v12 = vpop.xlane.xlu0 %707 }
 0x46f   : > { %1375 = vrcp.f32 %v708_v12 }
 0x472   : > { %v711_v13 = vpop.xlane.xlu1 %710  ;;  %v870_v17 = vpop.permute.xlu0 %869 }
 0x473   : > { %1377 = vrcp.f32 %v711_v13  ;;  %v875_v22 = vsel %vm729_vm3, %v870_v17, 0 }
 0x475   : > { %v1374_v14 = vpop.eup %1373 }
 0x476   : > { %v717_v15 = vmul.f32 %v1374_v14, %v1366_v1  ;;  %v822_v16 = vpop.permute.xlu1 %821 }
 0x477   : > { %v827_v18 = vsel %vm729_vm3, %v822_v16, 0 }
 0x478   : > { %1256 = vmatpush3.bf16.msra.mxu1 %v827_v18  ;;  %v721_v19 = vpack.c.bf16 %v717_v15, %v717_v15 }
 0x479   : > { %v1376_v20 = vpop.eup %1375  ;;  %1267 = vmatprep.subr.bf16.mxu1 %v1583_v0 }
 0x47a   : > { %v718_v21 = vmul.f32 %v1376_v20, %v1368_v3  ;;  %1252 = vmatmul.mubr.msk.bf16.vlgmr.msra.gmra.mrb[12].mxu0 %vm482_vm2, %v721_v19 }
 0x47b   : > { %1262 = vmatpush3.bf16.msra.mxu0 %v875_v22  ;;  %1263 = vmatprep.mubr.msk.bf16.mxu0 %vm1584_vm0, %v1583_v0 }
 0x47c   : > { %v722_v23 = vpack.c.bf16 %v718_v21, %v718_v21 }
 0x47d   : > { %v1378_v24 = vpop.eup %1377 }
 0x47e   : > { %v719_v25 = vmul.f32 %v1378_v24, %v1370_v5  ;;  %1258 = vmatmul.mubr.msk.bf16.vlgmr.msra.gmra.mrb[12].mxu1 %vm482_vm2, %v722_v23 }
 0x47f   : > { %1271 = vmatprep.mubr.msk.bf16.mxu1 %vm1584_vm0, %v1583_v0  ;;  %1268 = vmatpush3.bf16.msra.mxu1 %v1361_v31 }
 0x480   : > { %v723_v26 = vpack.c.bf16 %v719_v25, %v719_v25  ;;  %1269 = vmatprep.subr.bf16.mxu1 %v1583_v0 }
 0x482   : > { %1264 = vmatmul.mubr.msk.bf16.vlgmr.msra.gmra.mrb[16].mxu0 %vm482_vm2, %v723_v26 }
 0x483   : > { %1270 = vmatpush3.bf16.msra.mxu1 %v1362_v32 }
 0x4e8   : > { %v767_v27 = vpop.f32.mrb[8].mxu1 }
 0x4e9   : > { %v1247_v28 = vpop.f32.mrb[9].mxu1 }
 0x4ea   : > { %v770_v29 = vpop.f32.mrb[10].mxu1 }
 0x4eb   : > { %v1248_v30 = vpop.f32.mrb[11].mxu1 }
 0x54d   : > { %v815_v33 = vpop.f32.mrb[12].mxu0 }
 0x54e   : > { %918 = vrot.lane.b32.xlu1 %v815_v33, %s1590_s2  ;;  %v1253_v34 = vpop.f32.mrb[13].mxu0  ;;  %s1497_s2 = scalar_lea.vmem %s1965_s21, 128 }
 0x54f   : > { %v818_v35 = vpop.f32.mrb[14].mxu0  ;;  %p1498_p2 = scmp.ne.s32.totalorder %s1965_s21, %s1497_s2 }
 0x550   : > { %v1254_v36 = vpop.f32.mrb[15].mxu0 }
 0x551   : > { %v863_v37 = vpop.f32.mrb[12].mxu1  ;;  %p1499_p6 = pnand %p1498_p2, %p2044_p13 }
 0x552   : > { %922 = vrot.lane.b32.xlu0 %v863_v37, %s1591_s18  ;;  %v1259_v38 = vpop.f32.mrb[13].mxu1  ;;  %s1503_s18 = scalar_lea.vmem %s1502_s4, 256 }
 0x553   : > { %v866_v39 = vpop.f32.mrb[14].mxu1  ;;  %p1500_p10 = pneg %p1499_p6  ;;  %p1505_p5 = scmp.lt.s32.totalorder %s1503_s18, %s1497_s2 }
 0x554   : > { %v1260_v40 = vpop.f32.mrb[15].mxu1 }
 0x555   : > { %v911_v41 = vpop.f32.mrb[16].mxu0  ;;  %p1506_p3 = por %p1505_p5, %p1504_p4 }
 0x556   : > { %926 = vrot.lane.b32.xlu1 %v911_v41, %s1592_s26  ;;  %v1265_v42 = vpop.f32.mrb[17].mxu0 }
 0x557   : > { %v914_v0 = vpop.f32.mrb[18].mxu0  ;;  %p1507_p7 = pnand %p1506_p3, %p1500_p10 }
 0x558   : > { %v1266_v43 = vpop.f32.mrb[19].mxu0 }
 0x5c0   : > { %v919_v44 = vpop.permute.xlu1 %918 }
 0x5c1   : > { %v929_v46 = vsel %vm482_vm2, %v767_v27, %v919_v44 }
 0x5c4   : > { %v923_v45 = vpop.permute.xlu0 %922 }
 0x5c5   : > { %v931_v47 = vsel %vm930_vm4, %v929_v46, %v923_v45 }
 0x5c8   : > { %v927_v48 = vpop.permute.xlu1 %926 }
 0x5c9   : > { %v933_v49 = vsel %vm932_vm5, %v931_v47, %v927_v48 }
 0x5ca   : > { %v934_v50 = vpack.c.bf16 %v933_v49, %v933_v49 }
 0x5cc   : > { %1272 = vmatmul.mubr.msk.bf16.vlgmr.msra.gmra.mrb[16].mxu1 %vm421_vm1, %v934_v50 }
 0x69f   : > { %v990_v52 = vpop.f32.mrb[16].mxu1 }
 0x6a0   : > { %v991_v54 = vadd.f32 %v1179_v51, %v990_v52  ;;  %v1273_v55 = vpop.f32.mrb[17].mxu1 }
 0x6a1   : > { %v993_v56 = vpop.f32.mrb[18].mxu1 }
 0x6a2   : > { %v1274_v57 = vpop.f32.mrb[19].mxu1  ;;  %v996_v58 = vadd.f32 %v991_v54, %v390_v53 }
 0x6a4   : > { %v997_v59 = vsel %vm421_vm1, %v996_v58, 0.0 }
 0x6a5   : > { %998 = vadd.xlane.f32.xlu0 %v997_v59 }
 0x732   : > { %v999_v60 = vpop.xlane.xlu0 %998 }
 0x733   : > { %v1001_v61 = vmul.f32 0.03125, %v999_v60 }
 0x735   : > { %v1002_v62 = vsub.f32 %v996_v58, %v1001_v61 }
 0x737   : > { %v1003_v63 = vmul.f32 %v1002_v62, %v1002_v62 }
 0x739   : > { %v1004_v1 = vsel %vm421_vm1, %v1003_v63, 0.0 }
 0x73a   : > { %1005 = vadd.xlane.f32.xlu1 %v1004_v1 }
 0x7c7   : > { %v1006_v2 = vpop.xlane.xlu1 %1005 }
 0x7c8   : > { %v1007_v3 = vmul.f32 0.03125, %v1006_v2 }
 0x7ca   : > { %v1008_v4 = vadd.f32 1e-05, %v1007_v3 }
 0x7cc   : > { %1379 = vrsqrt.f32 %v1008_v4 }
 0x7d6   : > { %v1380_v5 = vpop.eup %1379 }
 0x7d7   : > { %v1010_v7 = vmul.f32 %v1380_v5, %v1002_v62 }
 0x7d9   : > { %v1017_v9 = vmul.f32 %v1183_v6, %v1010_v7 }
 0x7db   : > { %v1024_v10 = vadd.f32 %v1184_v8, %v1017_v9 }
 0x7dd   : > { %1025 = vst.msk [vmem:[%s386_s29] sm:$0xff] %vm421_vm1, %v1024_v10 }
 0x7de   : > { %1510 = shalt.err (!%p1507_p7)
}
 0x7df   : > { %s1511_s25 = scalar_lea.hbm %s1963_s10, 128  ;;  %s1515_s15 = scalar_lea.hbm %s2016_s8, 256 }
 0x7e0   : > { %p1512_p1 = scmp.ne.s32.totalorder %s1963_s10, %s1511_s25  ;;  %p1516_p0 = scmp.lt.u32.totalorder %s1963_s10, %s2016_s8 }
 0x7e1   : > { %p1517_p9 = scmp.lt.u32.totalorder %s1515_s15, %s1511_s25  ;;  %p1519_p2 = scmp.lt.u32.totalorder %s1511_s25, %s1963_s10 }
 0x7e2   : > { %p1513_p8 = pnand %p1512_p1, %p2044_p13 }
 0x7e3   : > { %p1518_p12 = por %p1517_p9, %p1516_p0 }
 0x7e4   : > { %p1514_p11 = pneg %p1513_p8 }
 0x7e5   : > { %p1520_p6 = por %p1519_p2, %p1518_p12 }
 0x7e7   : > { %p1521_p10 = pnand %p1520_p6, %p1514_p11 }
 0x7e9   : > { %1524 = shalt.err (!%p1521_p10)
}
 0x7ea   : > { %1287 = dma.vmem_to_hbm [thread:$0]  (%p2044_p13), %s1965_s21, 128, %s1963_s10, %s1027_s20  }
 0x7eb PF: > { %s1052_s19 = sand.u32 1, %s1563_s27   ;;  %p2045_p4 = scmp.ne.s32.totalorder %s2028_s12, 0 }
 0x7ec   : > { %p2046_p5 = scmp.ge.s32.totalorder %s1575_s30, 2  ;;  %s1053_s14 = scalar_lea.sflag [#allocation4], %s1052_s19 }
 0x7ee   : > { %p1304_p3 = pnand %p2046_p5, %p2045_p4 }
 0x7f0   : > { %1558 = dma.done.wait (!%p1304_p3), %s1053_s14, 128  }
 0x7f1   : > { %1560 = vsyncadd (!%p1304_p3), %s1053_s14, 4294967168  ;;  %s2047_s30 = sld [smem:[#allocation17_spill]]  ;;  %s2048_s11 = sld [smem:[#allocation16_spill]] }
 0x7f2   : > { %s2049_s29 = sld [smem:[#allocation18_spill]]  ;;  %s2050_s27 = smov %s1567_s28 }
 0x7f7   : > { %p25_p7 = scmp.ge.s32.totalorder %s2047_s30, 4   ;;  %s2051_s28 = smov %s2048_s11 }
 0x7f9   :  { %27 = sbr.rel (!%p25_p7) target bundleno = 11 (0xb), region = 118 }
 0x800   :  { %1058 = vsyncpa [#allocation3], 1 }
 0x801   :  { %1060 = vsyncpa [#allocation3 + $0x1], 1 }
 0x802   :  { %1061 = vsyncpa [#allocation6], 1 }
 0x803   :  { %1063 = vsyncpa [#allocation6 + $0x1], 1 }
 0x804   :  { %1064 = vsyncpa [#allocation9], 1 }
 0x805   :  { %1065 = vsyncpa [#allocation4], 1 }
 0x806   :  { %1067 = vsyncpa [#allocation4 + $0x1], 1 }

</bundles_post_ra>
